<compile_context>
chip_gen: v5e
topology: v5e:2x2
jax: 0.10.0
libtpu: 0.0.40
codegen_flags: <defaults>
</compile_context>

<pallas_src>
import functools
import math

import jax
import jax.numpy as jnp
from jax import lax
from jax.experimental import pallas as pl
from jax.experimental.pallas import tpu as pltpu


def _label_smoothing_kernel(logits_ref, tgt_ref, out_ref, acc_ref, *,
                            confidence, smooth_val, log_conf, log_smooth,
                            ignore_index, vocab, row_tile, n_valid, need_mask):
    """Grid is (cores, steps). One step processes a (row_tile, V) logits tile
    plus (row_tile, 1) targets; per-row KL partials accumulate in acc_ref and
    are reduced to this core's (1, 128) output only on the last step."""
    i = pl.program_id(1)

    @pl.when(i == 0)
    def _():
        acc_ref[...] = jnp.zeros_like(acc_ref)

    x = logits_ref[...].astype(jnp.float32)                    # (tm, V)
    tgt = tgt_ref[...].astype(jnp.int32)                       # (tm, 1)

    # Row-wise log-sum-exp and plain sum of logits.
    m = jnp.max(x, axis=-1, keepdims=True)                     # (tm, 1)
    lse = jnp.log(jnp.sum(jnp.exp(x - m), axis=-1, keepdims=True)) + m
    s_x = jnp.sum(x, axis=-1, keepdims=True)                   # (tm, 1)

    # x[row, target[row]] via a lane mask (target is dynamic per row);
    # x[row, ignore_index] via a static slice (ignore_index is a Python int).
    cols = lax.broadcasted_iota(jnp.int32, x.shape, 1)
    x_t = jnp.sum(jnp.where(cols == tgt, x, 0.0), axis=-1, keepdims=True)
    x_ig = lax.slice_in_dim(x, ignore_index, ignore_index + 1, axis=1)

    vf = float(vocab)
    # Collapsed KL row-sums (logp_j = x_j - lse), grouped to limit cancellation.
    # Case target != ignore_index: (V-2) smoothed cols + 1 confidence col.
    kl_a = (smooth_val * ((vf - 2.0) * (log_smooth + lse) - (s_x - x_t - x_ig))
            + confidence * (log_conf + lse - x_t))
    # Case target == ignore_index: (V-1) smoothed cols, ignore col zeroed.
    kl_b = smooth_val * ((vf - 1.0) * (log_smooth + lse) - (s_x - x_ig))

    kl = jnp.where(tgt == ignore_index, kl_b, kl_a)             # (tm, 1)
    if need_mask:
        # Mask rows that only exist because N was padded up to the row tile.
        blk = pl.program_id(0) * pl.num_programs(1) + i
        rows = blk * row_tile + lax.broadcasted_iota(jnp.int32, (row_tile, 1), 0)
        kl = jnp.where(rows < n_valid, kl, 0.0)
    acc_ref[...] += kl

    @pl.when(i == pl.num_programs(1) - 1)
    def _():
        tot = jnp.sum(acc_ref[...], axis=0, keepdims=True)      # (1, 1)
        out_ref[...] = jnp.broadcast_to(tot, (1, 128))


def _vmem_capacity_bytes():
    try:
        return int(pltpu.get_tpu_info().vmem_capacity_bytes)
    except Exception:
        return 64 << 20     # conservative (v7x per-TC size); fine on v5e/v6e


def _per_row_vmem_bytes(v, itemsize):
    # Double-buffered logits tile + ~2 V-wide f32 temporaries (astype, exp(x-m))
    # + lane-padded (., 128) int32 target block (double-buffered).
    return 2 * v * itemsize + 2 * v * 4 + 2 * 128 * 4


def _pick_row_tile(n, v, itemsize, vmem_capacity, *, max_tile=8192):
    """Largest multiple of 8 that keeps the working set within a fraction of
    this generation's VMEM; decoupled from N (the wrapper pads + masks)."""
    per_row = _per_row_vmem_bytes(v, itemsize)
    budget = int(0.55 * vmem_capacity)
    rows = max(8, min(max_tile, budget // per_row))
    rows -= rows % 8
    rows = max(8, rows)
    n8 = ((n + 7) // 8) * 8
    return max(8, min(rows, n8))


def label_smoothing_loss(output, target, *, label_smoothing, tgt_vocab_size,
                         ignore_index=1, row_tile=None):
    """Forward pass of LabelSmoothingLoss. output: [N, V] float, target: [N] int."""
    n, v = output.shape
    assert v == tgt_vocab_size

    itemsize = jnp.dtype(output.dtype).itemsize
    vmem_cap = _vmem_capacity_bytes()
    if row_tile is None:
        row_tile = _pick_row_tile(n, v, itemsize, vmem_cap)
    assert row_tile % 8 == 0

    # Pad N up to a multiple of the row tile; padded rows are masked in-kernel.
    n_padded = ((n + row_tile - 1) // row_tile) * row_tile
    need_mask = n_padded != n
    if need_mask:
        output = jnp.pad(output, ((0, n_padded - n), (0, 0)))
        target_p = jnp.pad(target, (0, n_padded - n),
                           constant_values=ignore_index)
    else:
        target_p = target

    n_blocks = n_padded // row_tile
    cores = 2 if n_blocks % 2 == 0 else 1   # 2-TC split (v7x); serial loop of 2 elsewhere
    steps = n_blocks // cores

    # Static Python constants baked into the kernel (no captured jax arrays).
    confidence = float(1.0 - label_smoothing)
    smooth_val = float(label_smoothing) / float(tgt_vocab_size - 2)
    log_conf = math.log(confidence) if confidence > 0.0 else 0.0
    log_smooth = math.log(smooth_val) if smooth_val > 0.0 else 0.0

    kernel = functools.partial(
        _label_smoothing_kernel,
        confidence=confidence, smooth_val=smooth_val,
        log_conf=log_conf, log_smooth=log_smooth,
        ignore_index=int(ignore_index), vocab=int(v),
        row_tile=int(row_tile), n_valid=int(n), need_mask=bool(need_mask))

    tgt2d = target_p.astype(jnp.int32).reshape(n_padded, 1)

    # Generation-aware VMEM limit: working set + headroom, capped at ~75% of
    # physical VMEM (48 MiB on v7x, ~96 MiB on v5e/v6e); v5e's 16 MiB scoped
    # default makes an explicit limit mandatory.
    tile_bytes = row_tile * _per_row_vmem_bytes(v, itemsize) + (1 << 20)
    upper = max(40 << 20, int(0.75 * vmem_cap))
    vmem_limit = int(min(upper, max(32 << 20, tile_bytes + (8 << 20))))

    partials = pl.pallas_call(
        kernel,
        out_shape=jax.ShapeDtypeStruct((1, 128 * cores), jnp.float32),
        grid_spec=pltpu.PrefetchScalarGridSpec(
            num_scalar_prefetch=0,
            grid=(cores, steps),
            in_specs=[
                pl.BlockSpec((row_tile, v), lambda c, i: (c * steps + i, 0)),
                pl.BlockSpec((row_tile, 1), lambda c, i: (c * steps + i, 0)),
            ],
            out_specs=pl.BlockSpec((1, 128), lambda c, i: (0, c)),
            scratch_shapes=[pltpu.VMEM((row_tile, 1), jnp.float32)],
        ),
        compiler_params=pltpu.CompilerParams(
            dimension_semantics=("parallel", "arbitrary"),
            vmem_limit_bytes=vmem_limit),
    )(output, tgt2d)

    kl_sum = jnp.sum(partials.reshape(cores, 128)[:, 0])

    # Glue: normalization by the number of non-ignored targets (mask.size(0)).
    # (Division by zero if every target is ignored mirrors the PyTorch module.)
    count = jnp.sum(target != ignore_index).astype(jnp.float32)
    return kl_sum / count


def _reference(output, target, *, label_smoothing, tgt_vocab_size, ignore_index=1):
    """Pure-JAX reference mirroring the PyTorch forward exactly."""
    logp = jax.nn.log_softmax(output.astype(jnp.float32), axis=-1)
    n, v = output.shape
    smooth_val = label_smoothing / (tgt_vocab_size - 2)
    confidence = 1.0 - label_smoothing
    cols = jnp.arange(v)[None, :]
    td = jnp.where(cols == target[:, None], confidence, smooth_val)
    td = jnp.where(cols == ignore_index, 0.0, td)
    kl = jnp.where(td > 0, td * (jnp.log(jnp.where(td > 0, td, 1.0)) - logp), 0.0)
    count = jnp.sum(target != ignore_index).astype(jnp.float32)
    return jnp.sum(kl) / count


def _check(n, v, label_smoothing, ignore_index, key):
    k_logits, k_tgt = jax.random.split(key)
    output = jax.random.normal(k_logits, (n, v), dtype=jnp.float32)
    target = jax.random.randint(k_tgt, (n,), 0, v, dtype=jnp.int32)
    # Ensure a couple of targets hit ignore_index (their smoothed rows still
    # count in the KL sum; only the divisor excludes them).
    target = target.at[3].set(ignore_index).at[n - 1].set(ignore_index)

    loss = label_smoothing_loss(
        output, target,
        label_smoothing=label_smoothing,
        tgt_vocab_size=v,
        ignore_index=ignore_index,
    )
    loss = jax.block_until_ready(loss)

    ref = _reference(
        output, target,
        label_smoothing=label_smoothing,
        tgt_vocab_size=v,
        ignore_index=ignore_index,
    )
    assert jnp.allclose(loss, ref, rtol=1e-5, atol=1e-5), (n, v, loss, ref)


if __name__ == "__main__":
    key = jax.random.PRNGKey(0)
    k1, k2 = jax.random.split(key)

    # Small shapes consistent with the module: [N, vocab] logits + [N] targets.
    _check(16, 32, label_smoothing=0.1, ignore_index=1, key=k1)
    # Awkward N (not a multiple of 8) to exercise the padded/masked tail path.
    _check(13, 40, label_smoothing=0.1, ignore_index=1, key=k2)

    print("KERNEL_OK")
</pallas_src>

<mosaic_0001>
module attributes {stable_mosaic.version = 11 : i64} {
  func.func @_label_smoothing_kernel(%arg0: i32, %arg1: i32, %arg2: memref<16x32xf32, #tpu.memory_space<vmem>>, %arg3: memref<16x1xi32, #tpu.memory_space<vmem>>, %arg4: memref<1x128xf32, #tpu.memory_space<vmem>>, %arg5: memref<16x1xf32, #tpu.memory_space<vmem>>) attributes {dimension_semantics = [#tpu.dimension_semantics<parallel>, #tpu.dimension_semantics<arbitrary>], iteration_bounds = array<i64: 1, 1>, scalar_prefetch = 0 : i64, scratch_operands = 1 : i64, tpu.core_type = #tpu.core_type<tc>, window_params = [{transform_indices = @transform_0, window_bounds = array<i64: 16, 32>}, {transform_indices = @transform_1, window_bounds = array<i64: 16, 1>}, {transform_indices = @transform_2, window_bounds = array<i64: 1, 128>}]} {
    %c0_i32 = arith.constant 0 : i32
    %0 = arith.cmpi eq, %arg1, %c0_i32 : i32
    %1 = arith.extui %0 : i1 to i32
    %c0_i32_0 = arith.constant 0 : i32
    %2 = arith.cmpi ne, %1, %c0_i32_0 : i32
    scf.if %2 {
      %cst_22 = arith.constant 0.000000e+00 : f32
      %56 = vector.broadcast %cst_22 : f32 to vector<16x1xf32>
      %c0_23 = arith.constant 0 : index
      %c0_24 = arith.constant 0 : index
      %57 = vector.load %arg5[%c0_23, %c0_24] : memref<16x1xf32, #tpu.memory_space<vmem>>, vector<16x1xf32>
      tpu.vector_store %arg5[%c0_23, %c0_24], %56 {strides = array<i32>} : memref<16x1xf32, #tpu.memory_space<vmem>>, vector<16x1xf32>,
    } else {
    }
    %c0 = arith.constant 0 : index
    %c0_1 = arith.constant 0 : index
    %3 = vector.load %arg2[%c0, %c0_1] : memref<16x32xf32, #tpu.memory_space<vmem>>, vector<16x32xf32>
    %c0_2 = arith.constant 0 : index
    %c0_3 = arith.constant 0 : index
    %4 = vector.load %arg3[%c0_2, %c0_3] : memref<16x1xi32, #tpu.memory_space<vmem>>, vector<16x1xi32>
    %cst = arith.constant dense<0xFF800000> : vector<16xf32>
    %5 = vector.multi_reduction <maximumf>, %3, %cst [1] : vector<16x32xf32> to vector<16xf32>
    %6 = vector.shape_cast %5 : vector<16xf32> to vector<16x1xf32>
    %7 = vector.broadcast %6 : vector<16x1xf32> to vector<16x32xf32>
    %8 = arith.subf %3, %7 : vector<16x32xf32>
    %9 = math.exp %8 : vector<16x32xf32>
    %cst_4 = arith.constant dense<0.000000e+00> : vector<16xf32>
    %10 = vector.multi_reduction <add>, %9, %cst_4 [1] : vector<16x32xf32> to vector<16xf32>
    %11 = vector.shape_cast %10 : vector<16xf32> to vector<16x1xf32>
    %12 = math.log %11 : vector<16x1xf32>
    %13 = arith.addf %12, %6 : vector<16x1xf32>
    %cst_5 = arith.constant dense<0.000000e+00> : vector<16xf32>
    %14 = vector.multi_reduction <add>, %3, %cst_5 [1] : vector<16x32xf32> to vector<16xf32>
    %15 = vector.shape_cast %14 : vector<16xf32> to vector<16x1xf32>
    %16 = tpu.iota {dimensions = array<i32: 1>} : vector<16x32xi32>
    %17 = vector.broadcast %4 : vector<16x1xi32> to vector<16x32xi32>
    %18 = arith.cmpi eq, %16, %17 : vector<16x32xi32>
    %cst_6 = arith.constant 0.000000e+00 : f32
    %19 = vector.broadcast %cst_6 : f32 to vector<16x32xf32>
    %20 = arith.select %18, %3, %19 : vector<16x32xi1>, vector<16x32xf32>
    %cst_7 = arith.constant dense<0.000000e+00> : vector<16xf32>
    %21 = vector.multi_reduction <add>, %20, %cst_7 [1] : vector<16x32xf32> to vector<16xf32>
    %22 = vector.shape_cast %21 : vector<16xf32> to vector<16x1xf32>
    %23 = vector.extract_strided_slice %3 {offsets = [0, 1], sizes = [16, 1], strides = [1, 1]} : vector<16x32xf32> to vector<16x1xf32>
    %cst_8 = arith.constant -5.70378256 : f32
    %24 = vector.broadcast %cst_8 : f32 to vector<16x1xf32>
    %25 = arith.addf %24, %13 : vector<16x1xf32>
    %cst_9 = arith.constant 3.000000e+01 : f32
    %26 = vector.broadcast %cst_9 : f32 to vector<16x1xf32>
    %27 = arith.mulf %26, %25 : vector<16x1xf32>
    %28 = arith.subf %15, %22 : vector<16x1xf32>
    %29 = arith.subf %28, %23 : vector<16x1xf32>
    %30 = arith.subf %27, %29 : vector<16x1xf32>
    %cst_10 = arith.constant 0.00333333341 : f32
    %31 = vector.broadcast %cst_10 : f32 to vector<16x1xf32>
    %32 = arith.mulf %31, %30 : vector<16x1xf32>
    %cst_11 = arith.constant -0.105360515 : f32
    %33 = vector.broadcast %cst_11 : f32 to vector<16x1xf32>
    %34 = arith.addf %33, %13 : vector<16x1xf32>
    %35 = arith.subf %34, %22 : vector<16x1xf32>
    %cst_12 = arith.constant 0.899999976 : f32
    %36 = vector.broadcast %cst_12 : f32 to vector<16x1xf32>
    %37 = arith.mulf %36, %35 : vector<16x1xf32>
    %38 = arith.addf %32, %37 : vector<16x1xf32>
    %cst_13 = arith.constant -5.70378256 : f32
    %39 = vector.broadcast %cst_13 : f32 to vector<16x1xf32>
    %40 = arith.addf %39, %13 : vector<16x1xf32>
    %cst_14 = arith.constant 3.100000e+01 : f32
    %41 = vector.broadcast %cst_14 : f32 to vector<16x1xf32>
    %42 = arith.mulf %41, %40 : vector<16x1xf32>
    %43 = arith.subf %15, %23 : vector<16x1xf32>
    %44 = arith.subf %42, %43 : vector<16x1xf32>
    %cst_15 = arith.constant 0.00333333341 : f32
    %45 = vector.broadcast %cst_15 : f32 to vector<16x1xf32>
    %46 = arith.mulf %45, %44 : vector<16x1xf32>
    %c1_i32 = arith.constant 1 : i32
    %47 = vector.broadcast %c1_i32 : i32 to vector<16x1xi32>
    %48 = arith.cmpi eq, %4, %47 : vector<16x1xi32>
    %49 = arith.select %48, %46, %38 : vector<16x1xi1>, vector<16x1xf32>
    %c0_16 = arith.constant 0 : index
    %c0_17 = arith.constant 0 : index
    %50 = vector.load %arg5[%c0_16, %c0_17] : memref<16x1xf32, #tpu.memory_space<vmem>>, vector<16x1xf32>
    %51 = arith.addf %50, %49 : vector<16x1xf32>
    %c0_18 = arith.constant 0 : index
    %c0_19 = arith.constant 0 : index
    %52 = vector.load %arg5[%c0_18, %c0_19] : memref<16x1xf32, #tpu.memory_space<vmem>>, vector<16x1xf32>
    tpu.vector_store %arg5[%c0_18, %c0_19], %51 {strides = array<i32>} : memref<16x1xf32, #tpu.memory_space<vmem>>, vector<16x1xf32>,
    %c0_i32_20 = arith.constant 0 : i32
    %53 = arith.cmpi eq, %arg1, %c0_i32_20 : i32
    %54 = arith.extui %53 : i1 to i32
    %c0_i32_21 = arith.constant 0 : i32
    %55 = arith.cmpi ne, %54, %c0_i32_21 : i32
    scf.if %55 {
      %c0_22 = arith.constant 0 : index
      %c0_23 = arith.constant 0 : index
      %56 = vector.load %arg5[%c0_22, %c0_23] : memref<16x1xf32, #tpu.memory_space<vmem>>, vector<16x1xf32>
      %cst_24 = arith.constant dense<0.000000e+00> : vector<1xf32>
      %57 = vector.multi_reduction <add>, %56, %cst_24 [0] : vector<16x1xf32> to vector<1xf32>
      %58 = vector.shape_cast %57 : vector<1xf32> to vector<1x1xf32>
      %59 = vector.shape_cast %58 : vector<1x1xf32> to vector<1x1xf32>
      %60 = vector.broadcast %59 : vector<1x1xf32> to vector<1x128xf32>
      %c0_25 = arith.constant 0 : index
      %c0_26 = arith.constant 0 : index
      %61 = vector.load %arg4[%c0_25, %c0_26] : memref<1x128xf32, #tpu.memory_space<vmem>>, vector<1x128xf32>
      tpu.vector_store %arg4[%c0_25, %c0_26], %60 {strides = array<i32>} : memref<1x128xf32, #tpu.memory_space<vmem>>, vector<1x128xf32>,
    } else {
    }
    return
  }
  func.func @transform_0(%arg0: i32, %arg1: i32) -> (i32, i32) {
    %c1_i32 = arith.constant 1 : i32
    %0 = arith.muli %arg0, %c1_i32 : i32
    %1 = arith.addi %0, %arg1 : i32
    %c0_i32 = arith.constant 0 : i32
    %c0_i32_0 = arith.constant 0 : i32
    return %1, %c0_i32 : i32, i32
  }
  func.func @transform_1(%arg0: i32, %arg1: i32) -> (i32, i32) {
    %c1_i32 = arith.constant 1 : i32
    %0 = arith.muli %arg0, %c1_i32 : i32
    %1 = arith.addi %0, %arg1 : i32
    %c0_i32 = arith.constant 0 : i32
    %c0_i32_0 = arith.constant 0 : i32
    return %1, %c0_i32 : i32, i32
  }
  func.func @transform_2(%arg0: i32, %arg1: i32) -> (i32, i32) {
    %c0_i32 = arith.constant 0 : i32
    %c0_i32_0 = arith.constant 0 : i32
    return %c0_i32, %arg0 : i32, i32
  }
}

</mosaic_0001>

<bundles_post_ra>
// kernel: tpu_custom_call.1
= control target key start
LH: loop header
LB: loop body
LE: loop exit
PB: predicated region body
PF: predicated region fallthrough
CT: control target
= control target key end

     0   :  { %vm67_vm0 = vcmask 261120   ;;  %v260_v3 = vmov 0   ;;  %s332_s0 = inlined_call_operand.vmem [shape: f32[16,32], index: 0, kind: input, shape index: {}]   ;;  %s333_s1 = inlined_call_operand.vmem [shape: s32[16,1], index: 1, kind: input, shape index: {}]   ;;  %s334_s2 = inlined_call_operand.hbm [shape: f32[1,128], index: 2, kind: output, shape index: {}]  }
   0x1   :  { %v282_v0 = vld [vmem:[%s332_s0] sm:$0xff]  ;;  %223 = vset.pattern.permute.xlu1 %v260_v3  ;;  %224 = vset.pattern.permute.xlu2 %v260_v3 }
   0x2   :  { %v287_v1 = vld [vmem:[%s333_s1] sm:$0xff]  ;;  %v68_v2 = vsel %vm67_vm0, %v282_v0, -inf }
   0x3   :  { %7 = vsyncpa [#allocation4], 0  ;;  %69 = vmax.xlane.f32.xlu0 %v68_v2  ;;  %101 = vperm.xlu1 %223, %v287_v1   ;;  %v295_v4 = vld [vmem:[%s332_s0 + $0x8] sm:$0xff]  ;;  %v92_v7 = vsel %vm67_vm0, %v282_v0, 0.0  ;;  %v98_v11 = vlaneseq  ;;  %s261_s0 = smov 127   ;;  %vm60_vm3 = vcmask 7168  }
   0x4   :  { %225 = vset.pattern.permute.xlu0 %v260_v3  ;;  %v71_v5 = vsel %vm67_vm0, %v295_v4, -inf  ;;  %v302_v6 = vld [vmem:[%s333_s1 + $0x8] sm:$0xff]  ;;  %v95_v8 = vsel %vm67_vm0, %v295_v4, 0.0  ;;  %vm144_vm4 = vcmp.eq.s32.totalorder %v287_v1, 1  ;;  %s263_s1 = smov [#allocation3]   ;;  %s198_s20 = sshll.u32 %s334_s2, 4  ;;  %s199_s20 = int_to_ptr.hbm [resolvable:$true] %s198_s20 }
   0x5   :  { %v99_v14 = vand.u32 127, %v98_v11  ;;  %vm145_vm5 = vcmp.eq.s32.totalorder %v302_v6, 1  ;;  %s196_s17 = sshll.u32 %s263_s1, 4  ;;  %s197_s17 = int_to_ptr.vmem [resolvable:$true] %s196_s17 }
   0xb   :  { %72 = vmax.xlane.f32.xlu0 %v71_v5  ;;  %104 = vperm.xlu1 %223, %v302_v6   ;;  %v262_v5 = vmov 0.0  }
   0xc   :  { %61 = vst.msk [vmem:[#allocation2] sm:$0xff] %vm60_vm3, %v262_v5 }
   0xd   :  { %62 = vst.msk [vmem:[#allocation2 + $0x8] sm:$0xff] %vm60_vm3, %v262_v5 }
  0x13   :  { %93 = vadd.xlane.f32.xlu0 %v92_v7 }
  0x35   :  { %96 = vadd.xlane.f32.xlu1 %v95_v8 }
  0x75   :  { %v102_v9 = vpop.permute.xlu1 %101 }
  0x76   :  { %v70_v10 = vpop.xlane.xlu0 %69  ;;  %vm106_vm2 = vcmp.eq.s32.totalorder %v99_v14, %v102_v9 }
  0x77   :  { %v74_v12 = vsub.f32 %v282_v0, %v70_v10  ;;  %v108_v25 = vsel %vm106_vm2, %v282_v0, 0.0 }
  0x78   :  { %v110_v26 = vsel %vm67_vm0, %v108_v25, 0.0 }
  0x79   :  { %v76_v13 = vmul.f32 1.442695, %v74_v12  ;;  %v165_v12 = vld [vmem:[#allocation2 + $0x8] sm:$0xff] }
  0x7b   :  { %226 = vpow2.f32 %v76_v13 }
  0x7d   :  { %v105_v15 = vpop.permute.xlu1 %104 }
  0x7e   :  { %v73_v16 = vpop.xlane.xlu0 %72  ;;  %vm107_vm1 = vcmp.eq.s32.totalorder %v99_v14, %v105_v15 }
  0x7f   :  { %v75_v17 = vsub.f32 %v295_v4, %v73_v16  ;;  %v109_v18 = vsel %vm107_vm1, %v295_v4, 0.0 }
  0x80   :  { %v113_v19 = vsel %vm67_vm0, %v109_v18, 0.0 }
  0x81   :  { %v227_v20 = vpop.eup %226  ;;  %v78_v21 = vmul.f32 1.442695, %v75_v17  ;;  %114 = vadd.xlane.f32.xlu0 %v113_v19 }
  0x82   :  { %v80_v22 = vsel %vm67_vm0, %v227_v20, 0.0 }
  0x83   :  { %228 = vpow2.f32 %v78_v21  ;;  %81 = vadd.xlane.f32.xlu2 %v80_v22 }
  0x86   :  { %v94_v29 = vpop.xlane.xlu0 %93 }
  0x87   :  { %v138_v34 = vsub.f32 %v94_v29, %v282_v0 }
  0x89   :  { %v229_v23 = vpop.eup %228 }
  0x8a   :  { %v83_v24 = vsel %vm67_vm0, %v229_v23, 0.0 }
  0x8b   :  { %84 = vadd.xlane.f32.xlu2 %v83_v24 }
  0x93   :  { %111 = vadd.xlane.f32.xlu2 %v110_v26 }
  0xa8   :  { %v97_v42 = vpop.xlane.xlu1 %96 }
  0xa9   :  { %v139_v50 = vsub.f32 %v97_v42, %v295_v4 }
  0xf4   :  { %v115_v43 = vpop.xlane.xlu0 %114 }
  0xf5   :  { %v121_v51 = vsub.f32 %v97_v42, %v115_v43 }
  0xf6   :  { %v82_v27 = vpop.xlane.xlu2 %81 }
  0xf7   :  { %230 = vlog2.f32 %v82_v27  ;;  %v123_v59 = vsub.f32 %v121_v51, %v295_v4  ;;  %v164_v4 = vld [vmem:[#allocation2] sm:$0xff] }
  0xfd   :  { %v231_v28 = vpop.eup %230 }
  0xfe   :  { %v87_v30 = vmul.f32 0.6931472, %v231_v28  ;;  %v85_v31 = vpop.xlane.xlu2 %84 }
  0xff   :  { %232 = vlog2.f32 %v85_v31 }
 0x100   :  { %v90_v32 = vadd.f32 %v87_v30, %v70_v10 }
 0x102   :  { %v116_v33 = vadd.f32 -5.7037826, %v90_v32  ;;  %v128_v40 = vadd.f32 -0.105360515, %v90_v32 }
 0x104   :  { %v136_v35 = vmul.f32 31.0, %v116_v33  ;;  %v118_v46 = vmul.f32 30.0, %v116_v33 }
 0x105   :  { %v233_v36 = vpop.eup %232 }
 0x106   :  { %v89_v37 = vmul.f32 0.6931472, %v233_v36  ;;  %v140_v38 = vsub.f32 %v136_v35, %v138_v34  ;;  %v112_v39 = vpop.xlane.xlu2 %111 }
 0x107   :  { %v120_v41 = vsub.f32 %v94_v29, %v112_v39  ;;  %v130_v48 = vsub.f32 %v128_v40, %v112_v39 }
 0x108   :  { %v91_v44 = vadd.f32 %v89_v37, %v73_v16  ;;  %v142_v45 = vmul.f32 0.0033333334, %v140_v38 }
 0x109   :  { %v122_v47 = vsub.f32 %v120_v41, %v282_v0  ;;  %v132_v55 = vmul.f32 0.9, %v130_v48 }
 0x10a   :  { %v117_v49 = vadd.f32 -5.7037826, %v91_v44  ;;  %148 = vrot.lane.b32.xlu2 %v142_v45, %s261_s0  ;;  %v129_v58 = vadd.f32 -0.105360515, %v91_v44 }
 0x10b   :  { %v124_v52 = vsub.f32 %v118_v46, %v122_v47 }
 0x10c   :  { %v137_v53 = vmul.f32 31.0, %v117_v49  ;;  %v119_v54 = vmul.f32 30.0, %v117_v49  ;;  %v131_v63 = vsub.f32 %v129_v58, %v115_v43 }
 0x10d   :  { %v126_v56 = vmul.f32 0.0033333334, %v124_v52 }
 0x10e   :  { %v141_v57 = vsub.f32 %v137_v53, %v139_v50  ;;  %v125_v62 = vsub.f32 %v119_v54, %v123_v59  ;;  %v133_v2 = vmul.f32 0.9, %v131_v63 }
 0x10f   :  { %v134_v60 = vadd.f32 %v132_v55, %v126_v56 }
 0x110   :  { %v143_v61 = vmul.f32 0.0033333334, %v141_v57  ;;  %v127_v0 = vmul.f32 0.0033333334, %v125_v62 }
 0x112   :  { %150 = vrot.lane.b32.xlu0 %v143_v61, %s261_s0  ;;  %156 = vrot.lane.b32.xlu2 %v134_v60, %s261_s0  ;;  %v135_v3 = vadd.f32 %v133_v2, %v127_v0 }
 0x11a   :  { %158 = vrot.lane.b32.xlu0 %v135_v3, %s261_s0 }
 0x164   :  { %v149_v7 = vpop.permute.xlu2 %148 }
 0x16c   :  { %v157_v8 = vpop.permute.xlu2 %156 }
 0x16d   :  { %v162_v9 = vsel %vm144_vm4, %v149_v7, %v157_v8 }
 0x16e   :  { %v166_v10 = vadd.f32 %v164_v4, %v162_v9 }
 0x170   :  { %169 = vst.msk [vmem:[#allocation2] sm:$0xff] %vm60_vm3, %v166_v10 }
 0x177   :  { %v174_v16 = vld [vmem:[#allocation2] sm:$0xff] }
 0x178   :  { %v176_v18 = vsel %vm60_vm3, %v174_v16, 0.0 }
 0x184   :  { %v151_v11 = vpop.permute.xlu0 %150 }
 0x18c   :  { %v159_v13 = vpop.permute.xlu0 %158 }
 0x18d   :  { %v163_v14 = vsel %vm145_vm5, %v151_v11, %v159_v13 }
 0x18e   :  { %v167_v15 = vadd.f32 %v165_v12, %v163_v14 }
 0x190   :  { %170 = vst.msk [vmem:[#allocation2 + $0x8] sm:$0xff] %vm60_vm3, %v167_v15 }
 0x197   :  { %v175_v17 = vld [vmem:[#allocation2 + $0x8] sm:$0xff] }
 0x198   :  { %v177_v1 = vsel %vm60_vm3, %v175_v17, 0.0 }
 0x199   :  { %v178_v19 = vadd.f32 %v177_v1, %v176_v18 }
 0x19b   :  { %v179_v20 = vrot.slane %v178_v19, 4 }
 0x19d   :  { %v180_v21 = vadd.f32 %v179_v20, %v178_v19 }
 0x19f   :  { %v181_v22 = vrot.slane %v180_v21, 2 }
 0x1a1   :  { %v182_v23 = vadd.f32 %v181_v22, %v180_v21 }
 0x1a3   :  { %v183_v24 = vrot.slane %v182_v23, 1 }
 0x1a5   :  { %v184_v25 = vadd.f32 %v183_v24, %v182_v23 }
 0x1a7   :  { %187 = vperm.xlu2 %224, %v184_v25  }
 0x201   :  { %v188_v6 = vpop.permute.xlu2 %187 }
 0x202   :  { %190 = vst [vmem:[#allocation3] sm:$0x1] %v188_v6 }
 0x203   :  { %201 = dma.vmem_to_hbm [thread:$0]  %s197_s17, 16, %s199_s20, [#allocation4]  }
 0x204   :  { %258 = dma.done.wait [#allocation4], 16  }
 0x205   :  { %259 = vsyncadd [#allocation4], 4294967280 }
 0x206   :  { %206 = vsyncpa [#allocation4], 1 }

</bundles_post_ra>
